<compile_context>
chip_gen: v6e
topology: v6e:2x2x1
jax: 0.10.0
libtpu: 0.0.40
codegen_flags: <defaults>
</compile_context>

<pallas_src>
import math

import jax
import jax.numpy as jnp
from jax.experimental import pallas as pl
from jax.experimental.pallas import tpu as pltpu

D_MODEL = 20
MAX_LEN = 60
DROPOUT_P = 0.0  # module is constructed as PositionalEncoding(20, 0)

_LANE = 128
_SMALL_ONE_BLOCK_BYTES = 1 << 20   # <= 1 MiB padded: single block is fine
_JNP_FAST_PATH_BYTES = 256 << 10   # < 256 KiB: plain XLA fused add is faster


def _round_up(a: int, m: int) -> int:
    return (a + m - 1) // m * m


def build_pe_table(d_model: int, max_len: int, dtype=jnp.float32):
    """Deterministic positional-encoding table, identical to the torch __init__."""
    position = jnp.arange(max_len, dtype=jnp.float32)[:, None]                 # (L, 1)
    div_term = jnp.exp(
        jnp.arange(0, d_model, 2, dtype=jnp.float32) * -(math.log(10000.0) / d_model)
    )                                                                          # (ceil(D/2),)
    angles = position * div_term                                               # (L, ceil(D/2))
    pe = jnp.zeros((max_len, d_model), dtype=jnp.float32)
    pe = pe.at[:, 0::2].set(jnp.sin(angles))
    pe = pe.at[:, 1::2].set(jnp.cos(angles[:, : d_model // 2]))                # floor(D/2) cols
    return pe.astype(dtype)


def _pe_add_kernel(x_ref, pe_ref, o_ref):
    # x_ref : (tb, tn) lane-dense tile of x
    # pe_ref: (1,  tn) positional-encoding row -> sublane-broadcast add on the VPU
    o_ref[...] = x_ref[...] + pe_ref[...]


def _vmem_budget():
    """(vmem_limit_bytes, target padded bytes per data block) for this chip."""
    try:
        vmem_cap = int(pltpu.get_tpu_info().vmem_capacity_bytes)
    except Exception:
        vmem_cap = 64 << 20  # assume smallest per-core VMEM (v7x) when unknown
    # Leave headroom under physical VMEM; never ask for less than 32 MiB.
    vmem_limit = max(min(vmem_cap - (16 << 20), 64 << 20), 32 << 20)
    # 2x double-buffered input + 2x output blocks (+ tiny PE row) must fit with slack.
    target_block = vmem_limit // 6
    return vmem_limit, target_block


def _choose_tiles(B: int, n: int, itemsize: int, target_block_bytes: int):
    """Pick (tb, tn) using the *padded* lane footprint and dtype sublane packing."""
    sub = max(8, 32 // itemsize)               # sublane packing: 8 f32 / 16 bf16 / 32 int8
    n_pad = _round_up(n, _LANE)                # real lane footprint of one row
    row_bytes = n_pad * itemsize
    total_padded = B * row_bytes

    if total_padded <= _SMALL_ONE_BLOCK_BYTES:
        return B, n                            # one block, grid (1, 1)

    if B > sub and row_bytes * sub <= target_block_bytes:
        # Tile the batch; keep full lane-dense rows.
        tb = (target_block_bytes // row_bytes) // sub * sub
        tb = max(sub, min(tb, _round_up(B, sub)))
        # Keep >= 2 grid steps so pipelining overlaps and both v7x TCs get work.
        tb = min(tb, _round_up(pl.cdiv(B, 2), sub))
        return tb, n

    # Small batch (or very long rows): tile the flattened feature axis too.
    tb = B if B <= sub else sub
    tn = (target_block_bytes // (tb * itemsize)) // _LANE * _LANE
    tn = max(_LANE, tn)
    if tn >= n:
        tn = n
    if pl.cdiv(B, tb) * pl.cdiv(n, tn) < 2 and n >= 2 * _LANE:
        tn = _round_up(pl.cdiv(n, 2), _LANE)   # force >= 2 grid steps
    return tb, tn


def positional_encoding(x: jax.Array, pe_table: jax.Array, *, force_pallas: bool = False):
    """x: (B, S, D). Returns x + pe[:S] (dropout p=0 -> identity)."""
    B, S, D = x.shape
    assert S <= pe_table.shape[0] and D == pe_table.shape[1]

    pe_slice = pe_table[:S, :].astype(x.dtype)
    # TODO(synk): torch adds the float32 `pe` buffer and lets the sum promote; casting
    # to x.dtype here can differ by ~1 ulp for bf16/fp16 inputs (f32 inputs identical).

    itemsize = jnp.dtype(x.dtype).itemsize
    n = S * D
    total_bytes = B * n * itemsize

    if not force_pallas and total_bytes < _JNP_FAST_PATH_BYTES:
        # Tiny tensors: kernel launch + DMA setup dominate; XLA's fused add wins.
        return x + pe_slice[None]

    x2 = x.reshape(B, n)                        # lane-dense rows (D alone is only 20 wide)
    pe_flat = pe_slice.reshape(1, n)

    vmem_limit, target_block = _vmem_budget()
    tb, tn = _choose_tiles(B, n, itemsize, target_block)
    grid = (pl.cdiv(B, tb), pl.cdiv(n, tn))

    out = pl.pallas_call(
        _pe_add_kernel,
        out_shape=jax.ShapeDtypeStruct((B, n), x.dtype),
        grid=grid,
        in_specs=[
            pl.BlockSpec((tb, tn), lambda i, j: (i, j)),   # batch x feature tile of x
            pl.BlockSpec((1, tn), lambda i, j: (0, j)),    # PE row, VMEM-resident per j
        ],
        out_specs=pl.BlockSpec((tb, tn), lambda i, j: (i, j)),
        # Only avoids an HBM copy if the caller donates x at the jit boundary;
        # otherwise XLA silently inserts a copy (harmless, documented intent).
        input_output_aliases={0: 0},
        compiler_params=pltpu.CompilerParams(
            dimension_semantics=("parallel", "parallel"),
            vmem_limit_bytes=vmem_limit,
        ),
        cost_estimate=pl.CostEstimate(
            flops=B * n,
            transcendentals=0,
            bytes_accessed=2 * B * n * itemsize + n * itemsize,
        ),
    )(x2, pe_flat)

    # Dropout: module is constructed with p=0.0 -> identity at all times.
    # TODO(synk): if p>0 were required in train mode, generate a keep-mask with
    # pltpu.prng_seed / pltpu.prng_random_bits inside the kernel and scale by 1/(1-p).
    return out.reshape(B, S, D)


if __name__ == "__main__":
    key = jax.random.PRNGKey(0)
    k_small, k_big = jax.random.split(key)
    pe_table = build_pe_table(D_MODEL, MAX_LEN)

    # Small shape consistent with PositionalEncoding(20, 0); force the Pallas path.
    B, S, D = 2, 8, D_MODEL
    x = jax.random.normal(k_small, (B, S, D), dtype=jnp.float32)
    out = jax.block_until_ready(positional_encoding(x, pe_table, force_pallas=True))
    ref = x + pe_table[None, :S, :]
    assert out.shape == (B, S, D)
    assert jnp.allclose(out, ref, atol=1e-6, rtol=1e-6), "small-shape mismatch vs reference"

    # Auto path for the same tiny input takes the jnp fast path; must agree too.
    out_auto = jax.block_until_ready(positional_encoding(x, pe_table))
    assert jnp.allclose(out_auto, ref, atol=1e-6, rtol=1e-6), "fast-path mismatch vs reference"

    # Larger batch exercises the batch-tiled, multi-step pipelined Pallas path.
    Bb, Sb = 512, MAX_LEN
    xb = jax.random.normal(k_big, (Bb, Sb, D_MODEL), dtype=jnp.float32)
    outb = jax.block_until_ready(positional_encoding(xb, pe_table, force_pallas=True))
    refb = xb + pe_table[None, :Sb, :]
    assert outb.shape == (Bb, Sb, D_MODEL)
    assert jnp.allclose(outb, refb, atol=1e-6, rtol=1e-6), "tiled-path mismatch vs reference"

    print("KERNEL_OK")
</pallas_src>

<mosaic_0001>
module attributes {stable_mosaic.version = 11 : i64} {
  func.func @_pe_add_kernel(%arg0: i32, %arg1: i32, %arg2: memref<2x160xf32, #tpu.memory_space<vmem>>, %arg3: memref<1x160xf32, #tpu.memory_space<vmem>>, %arg4: memref<2x160xf32, #tpu.memory_space<vmem>>) attributes {dimension_semantics = [#tpu.dimension_semantics<parallel>, #tpu.dimension_semantics<parallel>], iteration_bounds = array<i64: 1, 1>, scalar_prefetch = 0 : i64, scratch_operands = 0 : i64, tpu.core_type = #tpu.core_type<tc>, window_params = [{transform_indices = @transform_0, window_bounds = array<i64: 2, 160>}, {transform_indices = @transform_1, window_bounds = array<i64: 1, 160>}, {transform_indices = @transform_2, window_bounds = array<i64: 2, 160>}]} {
    %c0 = arith.constant 0 : index
    %c0_0 = arith.constant 0 : index
    %0 = vector.load %arg2[%c0, %c0_0] : memref<2x160xf32, #tpu.memory_space<vmem>>, vector<2x160xf32>
    %c0_1 = arith.constant 0 : index
    %c0_2 = arith.constant 0 : index
    %1 = vector.load %arg3[%c0_1, %c0_2] : memref<1x160xf32, #tpu.memory_space<vmem>>, vector<1x160xf32>
    %2 = vector.broadcast %1 : vector<1x160xf32> to vector<2x160xf32>
    %3 = arith.addf %0, %2 : vector<2x160xf32>
    %c0_3 = arith.constant 0 : index
    %c0_4 = arith.constant 0 : index
    %4 = vector.load %arg4[%c0_3, %c0_4] : memref<2x160xf32, #tpu.memory_space<vmem>>, vector<2x160xf32>
    tpu.vector_store %arg4[%c0_3, %c0_4], %3 {strides = array<i32>} : memref<2x160xf32, #tpu.memory_space<vmem>>, vector<2x160xf32>,
    return
  }
  func.func @transform_0(%arg0: i32, %arg1: i32) -> (i32, i32) {
    %c0_i32 = arith.constant 0 : i32
    return %arg0, %arg1 : i32, i32
  }
  func.func @transform_1(%arg0: i32, %arg1: i32) -> (i32, i32) {
    %c0_i32 = arith.constant 0 : i32
    %c0_i32_0 = arith.constant 0 : i32
    return %c0_i32, %arg1 : i32, i32
  }
  func.func @transform_2(%arg0: i32, %arg1: i32) -> (i32, i32) {
    %c0_i32 = arith.constant 0 : i32
    return %arg0, %arg1 : i32, i32
  }
}

</mosaic_0001>

<bundles_post_ra>
// kernel: tpu_custom_call.1
= control target key start
LH: loop header
LB: loop body
LE: loop exit
PB: predicated region body
PF: predicated region fallthrough
CT: control target
= control target key end

     0   :  { %7 = vsyncpa [#allocation3], 0  ;;  %s138_s0 = inlined_call_operand.hbm [shape: f32[2,160], index: 0, kind: input, shape index: {}, may-alias: {0,2}]   ;;  %s139_s1 = inlined_call_operand.vmem [shape: f32[1,160], index: 1, kind: input, shape index: {}]   ;;  %s140_s2 = inlined_call_operand.hbm [shape: f32[2,160], index: 2, kind: output, shape index: {}, may-alias: {0,2}]  }
   0x1   :  { %8 = vsyncpa [#allocation4], 0  ;;  %s111_s9 = smov [#allocation2]  }
   0x2   :  { %s15_s10 = sshll.u32 %s111_s9, 4  ;;  %s16_s10 = int_to_ptr.vmem [resolvable:$true] %s15_s10 }
   0x3   :  { %s75_s11 = scalar_lea.vmem %s16_s10, 64  ;;  %p80_p1 = scmp.lt.s32.totalorder %s16_s10, %s16_s10 }
   0x4   :  { %p76_p0 = scmp.ne.s32.totalorder %s16_s10, %s75_s11  ;;  %p81_p2 = scmp.lt.s32.totalorder %s75_s11, %s75_s11 }
   0x6   :  { %p82_p3 = por %p81_p2, %p80_p1 }
   0x8   :  { %p83_p4 = pnand %p82_p3, %p76_p0 }
   0xa   :  { %86 = shalt.err (!%p83_p4)
}
   0xb   :  { %18 = dma.hbm_to_vmem [thread:$0]  %s138_s0, 64, %s16_s10, [#allocation3]  }
   0xc   :  { %107 = dma.done.wait [#allocation3], 64  }
   0xd   :  { %108 = vsyncadd [#allocation3], 4294967232  ;;  %v27_v0 = vlaneseq  ;;  %v112_v1 = vmov 1983009808   ;;  %v25_v7 = vld [vmem:[%s139_s1] sm:$0x3] }
   0xe   :  { %v37_v2 = vunpack.c.l.s4 %v112_v1  ;;  %vm45_vm0 = vcmask 1041408   ;;  %vm46_vm1 = vcmask 257026   ;;  %v24_v12 = vld [vmem:[#allocation2] sm:$0xf]  ;;  %s113_s0 = smov [#allocation5]  }
   0xf   :  { %v28_v3 = vshrl.u32 %v27_v0, 7  ;;  %s55_s16 = sshll.u32 %s113_s0, 4  ;;  %vm47_vm2 = vmor %vm46_vm1, %vm45_vm0  ;;  %s56_s16 = int_to_ptr.vmem [resolvable:$true] %s55_s16 }
  0x10   :  { %v38_v6 = vunpack.c.0.s8 %v37_v2  ;;  %s87_s17 = scalar_lea.vmem %s56_s16, 64  ;;  %p92_p6 = scmp.lt.s32.totalorder %s56_s16, %s56_s16 }
  0x11   :  { %v29_v4 = vsub.s32 0, %v28_v3  ;;  %v33_v5 = vsub.s32 1, %v28_v3  ;;  %p88_p5 = scmp.ne.s32.totalorder %s56_s16, %s87_s17  ;;  %p93_p7 = scmp.lt.s32.totalorder %s87_s17, %s87_s17 }
  0x12   :  { %v41_v10 = vsub.s32 %v38_v6, %v28_v3 }
  0x13   :  { %v30_v8 = vrot.slane %v25_v7, %v29_v4  ;;  %v34_v9 = vrot.slane %v25_v7, %v33_v5  ;;  %p94_p8 = por %p93_p7, %p92_p6 }
  0x15   :  { %v35_v11 = vcombine.low %v30_v8, %v34_v9  ;;  %p95_p9 = pnand %p94_p8, %p88_p5 }
  0x17   :  { %v42_v13 = vrot.slane %v35_v11, %v41_v10 }
  0x19   :  { %v44_v14 = vadd.f32 %v42_v13, %v24_v12 }
  0x1b   :  { %48 = vst.msk [vmem:[#allocation5] sm:$0xf] %vm47_vm2, %v44_v14 }
  0x1c   :  { %98 = shalt.err (!%p95_p9)
}
  0x1d   :  { %58 = dma.vmem_to_hbm [thread:$0]  %s56_s16, 64, %s140_s2, [#allocation4]  }
  0x1e   :  { %109 = dma.done.wait [#allocation4], 64  }
  0x1f   :  { %110 = vsyncadd [#allocation4], 4294967232 }
  0x20   :  { %62 = vsyncpa [#allocation3], 1 }
  0x21   :  { %63 = vsyncpa [#allocation4], 1 }

</bundles_post_ra>
